<compile_context>
chip_gen: v6e
topology: v6e:2x2x1
jax: 0.10.0
libtpu: 0.0.40
codegen_flags: <defaults>
</compile_context>

<pallas_src>
import jax
import jax.numpy as jnp
from jax.experimental import pallas as pl
from jax.experimental.pallas import tpu as pltpu

LANE = 128       # vreg lane width
NEG_BIG = -1e30  # bias for padded output lanes -> exp() underflows to 0


def _round_up(x, m):
    return ((x + m - 1) // m) * m


def _device_kind():
    try:
        return jax.devices()[0].device_kind.lower()
    except Exception:
        return ""


def _num_tensorcores():
    kind = _device_kind()
    # v7x has 2 TensorCores per chip; v5e/v6e have 1.
    return 2 if ("v7" in kind or "tpu7" in kind) else 1


def _default_out_dtype():
    kind = _device_kind()
    # v5e is the most HBM-bandwidth constrained; halve output writeback there.
    if "v5 lite" in kind or "v5lite" in kind or "v5e" in kind:
        return jnp.bfloat16
    return jnp.float32


def mlp_softmax_kernel(x_ref, w1_ref, b1_ref, w2_ref, b2_ref, o_ref):
    """One (TB, *) batch tile: softmax(relu(x @ W1 + b1) @ W2 + b2)."""
    # ---- Linear 1 on the MXU: bf16 operands, f32 accumulation --------------
    h = jnp.dot(x_ref[...], w1_ref[...], preferred_element_type=jnp.float32)
    h = jnp.maximum(h + b1_ref[...], 0.0)                  # bias + ReLU (VPU)

    # ---- Linear 2 on the MXU: activations cast back to bf16, f32 acc -------
    logits = jnp.dot(h.astype(jnp.bfloat16), w2_ref[...],
                     preferred_element_type=jnp.float32)
    logits = logits + b2_ref[...]          # padded lanes carry a -1e30 bias

    # ---- numerically stable softmax over the lane-dense last axis ----------
    m = jnp.max(logits, axis=-1, keepdims=True)
    e = jnp.exp(logits - m)                                # EUP
    denom = jnp.sum(e, axis=-1, keepdims=True)             # XLU reduce
    inv = pl.reciprocal(denom, approx=True)                # EUP vrcp (free slot)
    o_ref[...] = (e * inv).astype(o_ref.dtype)


def prepare_weights(w1, b1, w2, b2):
    """One-time weight prep (run at weight-load time, NOT per forward call).

    w1: (in, 128)  b1: (1, 128)  w2: (128, out)  b2: (1, out)
    Pads out_features up to 128 lanes (padded logit lanes get a -1e30 bias so
    softmax assigns them ~0) and pre-casts the MXU operands to bf16.
    """
    in_features, hidden = w1.shape
    out_features = w2.shape[1]
    out_p = _round_up(out_features, LANE)

    w2_p = jnp.zeros((hidden, out_p), jnp.float32).at[:, :out_features].set(
        w2.astype(jnp.float32))
    # Keep b2 in f32 (the -1e30 pad bias must not be narrowed to fp16).
    b2_p = jnp.full((1, out_p), NEG_BIG, jnp.float32).at[:, :out_features].set(
        b2.astype(jnp.float32))

    return {
        "w1": jax.device_put(w1.astype(jnp.bfloat16)),
        "b1": jax.device_put(b1.reshape(1, hidden).astype(jnp.float32)),
        "w2": jax.device_put(w2_p.astype(jnp.bfloat16)),
        "b2": jax.device_put(b2_p),
        "in_features": in_features,
        "hidden": hidden,
        "out_features": out_features,
        "out_p": out_p,
    }


def my_model_forward(x, params, *, block_batch=1024, out_dtype=None,
                     num_cores=None):
    """Fused forward: softmax(relu(x @ W1 + b1) @ W2 + b2, axis=1)."""
    B = x.shape[0]
    in_features = params["in_features"]
    hidden = params["hidden"]
    out_features = params["out_features"]
    out_p = params["out_p"]

    if num_cores is None:
        num_cores = _num_tensorcores()
    if out_dtype is None:
        out_dtype = _default_out_dtype()

    # Only per-call prep in the hot path: bf16 MXU operand for x.
    x_b = x.astype(jnp.bfloat16)

    # ---- batch tiling --------------------------------------------------------
    # At least `num_cores` tiles (so v7x's two TensorCores both get work) and
    # at most block_batch rows per tile; tiles 16-row aligned for the bf16
    # x layout.  No explicit batch padding: grid = cdiv(B, tb) and Pallas
    # clips the final partial block (OOB rows are never written back; softmax
    # is row-independent, so garbage rows cannot contaminate valid ones).
    num_tiles = max(num_cores, pl.cdiv(B, block_batch))
    tb = _round_up(pl.cdiv(B, num_tiles), 16)
    if tb >= B:
        tb = B                      # single full-extent tile (always legal)
    grid = (pl.cdiv(B, tb),)

    # Advisory cost estimate so XLA schedules the surrounding cast/slice ops.
    out_bytes = jnp.dtype(out_dtype).itemsize
    cost = pl.CostEstimate(
        flops=2 * B * (in_features * hidden + hidden * out_p),
        transcendentals=B * (out_p + 1),
        bytes_accessed=(B * in_features * 2
                        + (in_features * hidden + hidden * out_p) * 2
                        + (hidden + out_p) * 4
                        + B * out_p * out_bytes),
    )

    vmem = pltpu.MemorySpace.VMEM
    out = pl.pallas_call(
        mlp_softmax_kernel,
        out_shape=jax.ShapeDtypeStruct((B, out_p), out_dtype),
        grid=grid,
        in_specs=[
            # x: one (tb, in) tile per grid step (auto double-buffered).
            pl.BlockSpec((tb, in_features), lambda i: (i, 0), memory_space=vmem),
            # Weights / biases: constant index maps -> resident in VMEM,
            # no re-DMA across grid steps.
            pl.BlockSpec((in_features, hidden), lambda i: (0, 0), memory_space=vmem),
            pl.BlockSpec((1, hidden), lambda i: (0, 0), memory_space=vmem),
            pl.BlockSpec((hidden, out_p), lambda i: (0, 0), memory_space=vmem),
            pl.BlockSpec((1, out_p), lambda i: (0, 0), memory_space=vmem),
        ],
        out_specs=pl.BlockSpec((tb, out_p), lambda i: (i, 0), memory_space=vmem),
        compiler_params=pltpu.CompilerParams(
            dimension_semantics=("parallel",)),  # batch axis: megacore-shardable
        cost_estimate=cost,
    )(x_b, params["w1"], params["b1"], params["w2"], params["b2"])

    # Strip only the lane padding (no batch padding was added).
    return out[:, :out_features]


if __name__ == "__main__":
    input_size = 10
    hidden = 128
    output_size = 10
    batch = 8

    key = jax.random.PRNGKey(0)
    kx, k1, k2, k3, k4 = jax.random.split(key, 5)

    x = jax.random.normal(kx, (batch, input_size), dtype=jnp.float32)
    w1 = jax.random.normal(k1, (input_size, hidden), dtype=jnp.float32) * 0.1
    b1 = jax.random.normal(k2, (1, hidden), dtype=jnp.float32) * 0.1
    w2 = jax.random.normal(k3, (hidden, output_size), dtype=jnp.float32) * 0.1
    b2 = jax.random.normal(k4, (1, output_size), dtype=jnp.float32) * 0.1

    # One-time weight prep (padding + bf16 casts hoisted out of the hot path).
    params = prepare_weights(w1, b1, w2, b2)

    out = my_model_forward(x, params)
    jax.block_until_ready(out)

    # Pure-JAX reference that mirrors the bf16-operand / f32-accumulation path.
    def ref_fwd(xa):
        xb = xa.astype(jnp.bfloat16).astype(jnp.float32)
        w1b = w1.astype(jnp.bfloat16).astype(jnp.float32)
        w2b = w2.astype(jnp.bfloat16).astype(jnp.float32)
        h = jnp.maximum(xb @ w1b + b1, 0.0)
        hb = h.astype(jnp.bfloat16).astype(jnp.float32)
        return jax.nn.softmax(hb @ w2b + b2, axis=1)

    out_f = out.astype(jnp.float32)
    ref = ref_fwd(x)
    assert out.shape == (batch, output_size)
    assert jnp.allclose(out_f, ref, atol=2e-2, rtol=2e-2), \
        float(jnp.abs(out_f - ref).max())
    assert jnp.allclose(jnp.sum(out_f, axis=1), 1.0, atol=2e-2)

    # Exercise a larger batch (multi-tile on v7x; non-multiple-of-8 rows OK
    # because the overhanging final block is clipped by Pallas).
    batch2 = 200
    x2 = jax.random.normal(kx, (batch2, input_size), dtype=jnp.float32)
    out2 = my_model_forward(x2, params)
    jax.block_until_ready(out2)
    assert out2.shape == (batch2, output_size)
    assert jnp.allclose(out2.astype(jnp.float32), ref_fwd(x2), atol=2e-2, rtol=2e-2)

    print("KERNEL_OK")
</pallas_src>

<mosaic_0001>
module attributes {stable_mosaic.version = 11 : i64} {
  func.func @mlp_softmax_kernel(%arg0: i32, %arg1: memref<8x10xbf16, #tpu.memory_space<vmem>>, %arg2: memref<10x128xbf16, #tpu.memory_space<vmem>>, %arg3: memref<1x128xf32, #tpu.memory_space<vmem>>, %arg4: memref<128x128xbf16, #tpu.memory_space<vmem>>, %arg5: memref<1x128xf32, #tpu.memory_space<vmem>>, %arg6: memref<8x128xf32, #tpu.memory_space<vmem>>) attributes {dimension_semantics = [#tpu.dimension_semantics<parallel>], iteration_bounds = array<i64: 1>, scalar_prefetch = 0 : i64, scratch_operands = 0 : i64, tpu.core_type = #tpu.core_type<tc>, window_params = [{transform_indices = @transform_0, window_bounds = array<i64: 8, 10>}, {pipeline_mode = #tpu.pipeline_mode<synchronous>, transform_indices = @transform_1, window_bounds = array<i64: 10, 128>}, {pipeline_mode = #tpu.pipeline_mode<synchronous>, transform_indices = @transform_2, window_bounds = array<i64: 1, 128>}, {pipeline_mode = #tpu.pipeline_mode<synchronous>, transform_indices = @transform_3, window_bounds = array<i64: 128, 128>}, {pipeline_mode = #tpu.pipeline_mode<synchronous>, transform_indices = @transform_4, window_bounds = array<i64: 1, 128>}, {transform_indices = @transform_5, window_bounds = array<i64: 8, 128>}]} {
    %c0 = arith.constant 0 : index
    %c0_0 = arith.constant 0 : index
    %0 = vector.load %arg1[%c0, %c0_0] : memref<8x10xbf16, #tpu.memory_space<vmem>>, vector<8x10xbf16>
    %c0_1 = arith.constant 0 : index
    %c0_2 = arith.constant 0 : index
    %1 = vector.load %arg2[%c0_1, %c0_2] : memref<10x128xbf16, #tpu.memory_space<vmem>>, vector<10x128xbf16>
    %cst = arith.constant dense<0.000000e+00> : vector<8x128xf32>
    %2 = tpu.matmul %0, %1, %cst {dimension_numbers = #tpu.dot_dimension_numbers<[1], [0], [0], [1], [0, 0, 1, 1], [], []>} : vector<8x10xbf16>, vector<10x128xbf16>, vector<8x128xf32> -> vector<8x128xf32>
    %c0_3 = arith.constant 0 : index
    %c0_4 = arith.constant 0 : index
    %3 = vector.load %arg3[%c0_3, %c0_4] : memref<1x128xf32, #tpu.memory_space<vmem>>, vector<1x128xf32>
    %4 = vector.broadcast %3 : vector<1x128xf32> to vector<8x128xf32>
    %5 = arith.addf %2, %4 : vector<8x128xf32>
    %cst_5 = arith.constant 0.000000e+00 : f32
    %6 = vector.broadcast %cst_5 : f32 to vector<8x128xf32>
    %7 = arith.maximumf %5, %6 : vector<8x128xf32>
    %8 = arith.truncf %7 : vector<8x128xf32> to vector<8x128xbf16>
    %c0_6 = arith.constant 0 : index
    %c0_7 = arith.constant 0 : index
    %9 = vector.load %arg4[%c0_6, %c0_7] : memref<128x128xbf16, #tpu.memory_space<vmem>>, vector<128x128xbf16>
    %cst_8 = arith.constant dense<0.000000e+00> : vector<8x128xf32>
    %10 = tpu.matmul %8, %9, %cst_8 {dimension_numbers = #tpu.dot_dimension_numbers<[1], [0], [0], [1], [0, 0, 1, 1], [], []>} : vector<8x128xbf16>, vector<128x128xbf16>, vector<8x128xf32> -> vector<8x128xf32>
    %c0_9 = arith.constant 0 : index
    %c0_10 = arith.constant 0 : index
    %11 = vector.load %arg5[%c0_9, %c0_10] : memref<1x128xf32, #tpu.memory_space<vmem>>, vector<1x128xf32>
    %12 = vector.broadcast %11 : vector<1x128xf32> to vector<8x128xf32>
    %13 = arith.addf %10, %12 : vector<8x128xf32>
    %cst_11 = arith.constant dense<0xFF800000> : vector<8xf32>
    %14 = vector.multi_reduction <maximumf>, %13, %cst_11 [1] : vector<8x128xf32> to vector<8xf32>
    %15 = vector.shape_cast %14 : vector<8xf32> to vector<8x1xf32>
    %16 = vector.broadcast %15 : vector<8x1xf32> to vector<8x128xf32>
    %17 = arith.subf %13, %16 : vector<8x128xf32>
    %18 = math.exp %17 : vector<8x128xf32>
    %cst_12 = arith.constant dense<0.000000e+00> : vector<8xf32>
    %19 = vector.multi_reduction <add>, %18, %cst_12 [1] : vector<8x128xf32> to vector<8xf32>
    %20 = vector.shape_cast %19 : vector<8xf32> to vector<8x1xf32>
    %21 = tpu.reciprocal %20 {approx = true} : vector<8x1xf32> -> vector<8x1xf32>
    %22 = vector.broadcast %21 : vector<8x1xf32> to vector<8x128xf32>
    %23 = arith.mulf %18, %22 : vector<8x128xf32>
    %c0_13 = arith.constant 0 : index
    %c0_14 = arith.constant 0 : index
    %24 = vector.load %arg6[%c0_13, %c0_14] : memref<8x128xf32, #tpu.memory_space<vmem>>, vector<8x128xf32>
    tpu.vector_store %arg6[%c0_13, %c0_14], %23 {strides = array<i32>} : memref<8x128xf32, #tpu.memory_space<vmem>>, vector<8x128xf32>,
    return
  }
  func.func @transform_0(%arg0: i32) -> (i32, i32) {
    %c0_i32 = arith.constant 0 : i32
    %c0_i32_0 = arith.constant 0 : i32
    return %arg0, %c0_i32 : i32, i32
  }
  func.func @transform_1(%arg0: i32) -> (i32, i32) {
    %c0_i32 = arith.constant 0 : i32
    %c0_i32_0 = arith.constant 0 : i32
    %c0_i32_1 = arith.constant 0 : i32
    return %c0_i32, %c0_i32_0 : i32, i32
  }
  func.func @transform_2(%arg0: i32) -> (i32, i32) {
    %c0_i32 = arith.constant 0 : i32
    %c0_i32_0 = arith.constant 0 : i32
    %c0_i32_1 = arith.constant 0 : i32
    return %c0_i32, %c0_i32_0 : i32, i32
  }
  func.func @transform_3(%arg0: i32) -> (i32, i32) {
    %c0_i32 = arith.constant 0 : i32
    %c0_i32_0 = arith.constant 0 : i32
    %c0_i32_1 = arith.constant 0 : i32
    return %c0_i32, %c0_i32_0 : i32, i32
  }
  func.func @transform_4(%arg0: i32) -> (i32, i32) {
    %c0_i32 = arith.constant 0 : i32
    %c0_i32_0 = arith.constant 0 : i32
    %c0_i32_1 = arith.constant 0 : i32
    return %c0_i32, %c0_i32_0 : i32, i32
  }
  func.func @transform_5(%arg0: i32) -> (i32, i32) {
    %c0_i32 = arith.constant 0 : i32
    %c0_i32_0 = arith.constant 0 : i32
    return %arg0, %c0_i32 : i32, i32
  }
}

</mosaic_0001>

<bundles_post_ra>
// kernel: tpu_custom_call.1
= control target key start
LH: loop header
LB: loop body
LE: loop exit
PB: predicated region body
PF: predicated region fallthrough
CT: control target
= control target key end

     0   :  { %10 = vsyncpa [#allocation3], 0  ;;  %s475_s0 = inlined_call_operand.hbm [shape: bf16[8,10], index: 0, kind: input, shape index: {}]   ;;  %s476_s1 = inlined_call_operand.hbm [shape: bf16[10,128], index: 1, kind: input, shape index: {}]   ;;  %s477_s2 = inlined_call_operand.vmem [shape: f32[1,128], index: 2, kind: input, shape index: {}]   ;;  %s478_s3 = inlined_call_operand.hbm [shape: bf16[128,128], index: 3, kind: input, shape index: {}]   ;;  %s479_s4 = inlined_call_operand.vmem [shape: f32[1,128], index: 4, kind: input, shape index: {}]   ;;  %s480_s5 = inlined_call_operand.hbm [shape: f32[8,128], index: 5, kind: output, shape index: {}]  }
   0x1   :  { %11 = vsyncpa [#allocation6], 0 }
   0x2   :  { %12 = vsyncpa [#allocation4], 0  ;;  %s419_s18 = smov [#allocation5]  }
   0x3   :  { %s28_s19 = sshll.u32 %s419_s18, 4  ;;  %s29_s19 = int_to_ptr.vmem [resolvable:$true] %s28_s19 }
   0x4   :  { %s341_s20 = scalar_lea.vmem %s29_s19, 128  ;;  %p346_p1 = scmp.lt.s32.totalorder %s29_s19, %s29_s19 }
   0x5   :  { %p342_p0 = scmp.ne.s32.totalorder %s29_s19, %s341_s20  ;;  %p347_p2 = scmp.lt.s32.totalorder %s341_s20, %s341_s20 }
   0x7   :  { %p348_p3 = por %p347_p2, %p346_p1 }
   0x9   :  { %p349_p4 = pnand %p348_p3, %p342_p0 }
   0xb   :  { %352 = shalt.err (!%p349_p4)
}
   0xc   :  { %s420_s21 = smov 64   ;;  %s421_s22 = smov 4  }
   0xd   :  { %34 = dma.hbm_to_vmem [thread:$0]  %s476_s1, 128, %s29_s19, [#allocation6], %s420_s21, %s420_s21, %s421_s22  }
   0xe   :  { %s422_s25 = smov [#allocation2]   ;;  %s423_s27 = smov [#allocation7]  }
   0xf   :  { %s19_s26 = sshll.u32 %s422_s25, 4  ;;  %s42_s28 = sshll.u32 %s423_s27, 4  ;;  %s20_s26 = int_to_ptr.vmem [resolvable:$true] %s19_s26  ;;  %s43_s28 = int_to_ptr.vmem [resolvable:$true] %s42_s28 }
  0x10   :  { %s361_s29 = scalar_lea.vmem %s20_s26, 64  ;;  %p366_p6 = scmp.lt.s32.totalorder %s20_s26, %s20_s26 }
  0x11   :  { %p362_p5 = scmp.ne.s32.totalorder %s20_s26, %s361_s29  ;;  %p367_p7 = scmp.lt.s32.totalorder %s361_s29, %s361_s29 }
  0x13   :  { %p368_p8 = por %p367_p7, %p366_p6 }
  0x15   :  { %p369_p9 = pnand %p368_p8, %p362_p5 }
  0x17   :  { %372 = shalt.err (!%p369_p9)
}
  0x18   :  { %22 = dma.hbm_to_vmem [thread:$0]  %s475_s0, 64, %s20_s26, [#allocation3]  }
  0x19   :  { %s381_s7 = scalar_lea.vmem %s43_s28, 1024  ;;  %p386_p11 = scmp.lt.s32.totalorder %s43_s28, %s43_s28 }
  0x1a   :  { %p382_p10 = scmp.ne.s32.totalorder %s43_s28, %s381_s7  ;;  %p387_p12 = scmp.lt.s32.totalorder %s381_s7, %s381_s7 }
  0x1c   :  { %p388_p13 = por %p387_p12, %p386_p11 }
  0x1e   :  { %p389_p0 = pnand %p388_p13, %p382_p10 }
  0x20   :  { %392 = shalt.err (!%p389_p0)
}
  0x21   :  { %48 = dma.hbm_to_vmem [thread:$0]  %s478_s3, 1024, %s43_s28, [#allocation6], %s420_s21, %s420_s21, %s421_s22  }
  0x22   :  { %413 = dma.done.wait [#allocation3], 64  }
  0x23   :  { %414 = vsyncadd [#allocation3], 4294967232 }
  0x24   :  { %415 = dma.done.wait [#allocation6], 1152  }
  0x25   :  { %416 = vsyncadd [#allocation6], 4294966144  ;;  %v424_v0 = vmov 0.0   ;;  %vm425_vm0 = vmmov 0   ;;  %vm80_vm1 = vcmask 1044480   ;;  %vm76_vm2 = vcmask 80896  }
  0x26   :  { %286 = vmatprep.subr.bf16.mxu0 %v424_v0  ;;  %288 = vmatprep.mubr.msk.bf16.mxu0 %vm425_vm0, %v424_v0  ;;  %v320_v1 = vld [vmem:[#allocation5] sm:$0x1f]   ;;  %v61_v4 = vld [vmem:[#allocation2] sm:$0xf]  ;;  %v323_v6 = vld [vmem:[#allocation7 + $0x28] sm:$0xff]  }
  0x27   :  { %292 = vmatprep.subr.bf16.mxu1 %v424_v0  ;;  %308 = vmatprep.mubr.msk.bf16.mxu1 %vm425_vm0, %v424_v0  ;;  %v82_v2 = vsel %vm80_vm1, %v320_v1, 0  ;;  %v321_v3 = vld [vmem:[#allocation7 + $0x38] sm:$0xff]   ;;  %v322_v5 = vld [vmem:[#allocation7 + $0x30] sm:$0xff]   ;;  %v324_v7 = vld [vmem:[#allocation7 + $0x20] sm:$0xff]  }
  0x28   :  { %287 = vmatpush3.bf16.msra.mxu0 %v82_v2  ;;  %293 = vmatpush3.bf16.msra.mxu1 %v321_v3  ;;  %v325_v8 = vld [vmem:[#allocation7 + $0x18] sm:$0xff]   ;;  %v326_v9 = vld [vmem:[#allocation7 + $0x10] sm:$0xff]   ;;  %v327_v10 = vld [vmem:[#allocation7 + $0x8] sm:$0xff]  }
  0x29   :  { %294 = vmatprep.subr.bf16.mxu1 %v424_v0  ;;  %v328_v11 = vld [vmem:[#allocation7] sm:$0xff]   ;;  %v263_v12 = vld [vmem:[%s477_s2] ss:$0 sm:$0xff]  ;;  %s426_s2 = smov [#allocation8]  }
  0x2a   :  { %v266_v20 = vld [vmem:[%s479_s4] ss:$0 sm:$0xff]  ;;  %s253_s11 = sshll.u32 %s426_s2, 4  ;;  %s254_s11 = int_to_ptr.vmem [resolvable:$true] %s253_s11 }
  0x2b   :  { %289 = vmatmul.mubr.msk.bf16.vlgmr.msra.gmra.mxu0 %vm76_vm2, %v61_v4  ;;  %s393_s4 = scalar_lea.vmem %s254_s11, 128  ;;  %p398_p2 = scmp.lt.s32.totalorder %s254_s11, %s254_s11 }
  0x2c   :  { %295 = vmatpush3.bf16.msra.mxu1 %v322_v5  ;;  %p394_p1 = scmp.ne.s32.totalorder %s254_s11, %s393_s4  ;;  %p399_p3 = scmp.lt.s32.totalorder %s393_s4, %s393_s4 }
  0x2d   :  { %296 = vmatprep.subr.bf16.mxu1 %v424_v0 }
  0x2e   :  { %p400_p4 = por %p399_p3, %p398_p2 }
  0x30   :  { %297 = vmatpush3.bf16.msra.mxu1 %v323_v6  ;;  %p401_p5 = pnand %p400_p4, %p394_p1 }
  0x31   :  { %298 = vmatprep.subr.bf16.mxu1 %v424_v0 }
  0x34   :  { %299 = vmatpush3.bf16.msra.mxu1 %v324_v7 }
  0x35   :  { %300 = vmatprep.subr.bf16.mxu1 %v424_v0 }
  0x38   :  { %301 = vmatpush3.bf16.msra.mxu1 %v325_v8 }
  0x39   :  { %302 = vmatprep.subr.bf16.mxu1 %v424_v0 }
  0x3c   :  { %303 = vmatpush3.bf16.msra.mxu1 %v326_v9 }
  0x3d   :  { %304 = vmatprep.subr.bf16.mxu1 %v424_v0 }
  0x40   :  { %305 = vmatpush3.bf16.msra.mxu1 %v327_v10 }
  0x41   :  { %306 = vmatprep.subr.bf16.mxu1 %v424_v0 }
  0x44   :  { %307 = vmatpush3.bf16.msra.mxu1 %v328_v11 }
  0xeb   :  { %v118_v13 = vpop.f32.mrf.mxu0 }
  0xec   :  { %v119_v14 = vadd.f32 %v263_v12, %v118_v13 }
  0xed   :  { %v290_v15 = vpop.f32.mrf.mxu0 }
  0xee   :  { %v124_v16 = vmax.f32 %v119_v14, 0.0 }
  0xef   :  { %v121_v17 = vpop.f32.mrf.mxu0 }
  0xf0   :  { %v125_v18 = vpack.c.bf16 %v124_v16, %v124_v16 }
  0xf1   :  { %v291_v19 = vpop.f32.mrf.mxu0 }
  0xf2   :  { %309 = vmatmul.mubr.bf16.vlgmr.msra.gmra.mxu1 %v125_v18 }
 0x1b2   :  { %v231_v21 = vpop.f32.mrf.mxu1 }
 0x1b3   :  { %v232_v22 = vadd.f32 %v266_v20, %v231_v21 }
 0x1b4   :  { %v310_v23 = vpop.f32.mrf.mxu1 }
 0x1b5   :  { %237 = vmax.xlane.f32.xlu0 %v232_v22 }
 0x1b6   :  { %v234_v24 = vpop.f32.mrf.mxu1 }
 0x1b8   :  { %v311_v25 = vpop.f32.mrf.mxu1 }
 0x23e   :  { %v238_v26 = vpop.xlane.xlu0 %237 }
 0x23f   :  { %v239_v27 = vsub.f32 %v232_v22, %v238_v26 }
 0x241   :  { %v240_v28 = vmul.f32 1.442695, %v239_v27 }
 0x243   :  { %329 = vpow2.f32 %v240_v28 }
 0x250   :  { %v330_v29 = vpop.eup %329 }
 0x251   :  { %242 = vadd.xlane.f32.xlu0 %v330_v29 }
 0x2da   :  { %v243_v30 = vpop.xlane.xlu0 %242 }
 0x2db   :  { %331 = vrcp.f32 %v243_v30 }
 0x2e8   :  { %v332_v31 = vpop.eup %331 }
 0x2e9   :  { %v245_v32 = vmul.f32 %v332_v31, %v330_v29 }
 0x2eb   :  { %246 = vst [vmem:[#allocation8] sm:$0xff] %v245_v32 }
 0x2ec   :  { %404 = shalt.err (!%p401_p5)
}
 0x2ed   :  { %256 = dma.vmem_to_hbm [thread:$0]  %s254_s11, 128, %s480_s5, [#allocation4]  }
 0x2ee   :  { %417 = dma.done.wait [#allocation4], 128  }
 0x2ef   :  { %418 = vsyncadd [#allocation4], 4294967168 }
 0x2f0   :  { %260 = vsyncpa [#allocation3], 1 }
 0x2f1   :  { %261 = vsyncpa [#allocation6], 1 }
 0x2f2   :  { %262 = vsyncpa [#allocation4], 1 }

</bundles_post_ra>
